<compile_context>
chip_gen: v7x
topology: tpu7x:2x2x1
jax: 0.10.0
libtpu: 0.0.40
codegen_flags: <defaults>
</compile_context>

<pallas_src>
import functools

import numpy as np
import jax
import jax.numpy as jnp
from jax.experimental import pallas as pl
from jax.experimental.pallas import tpu as pltpu


def _ceil_div(a, b):
    return -(-a // b)


# ---------------------------------------------------------------------------
# Kernel: one MXU dot + masked running-max pooling + bias + tanh(tanh) + store
# ---------------------------------------------------------------------------
def _region_aware_conv_kernel(x_ref, w_ref, mask_ref, b_ref, out_ref, *,
                              H_max, LANES, C_pad):
    # x_ref:    (1, H_max*LANES, K_tot)  shift-stacked activations (im2col)
    # w_ref:    (K_tot, C_pad)           block-structured folded-BN weights
    # mask_ref: (H_max, C_pad)           per-output-column time-bin mask
    # b_ref:    (1, C_pad)               folded bias row (zeros in pad columns)
    # out_ref:  (1, LANES, C_pad)        LANES = B_blk * m positions
    big = jnp.dot(x_ref[0], w_ref[...], preferred_element_type=jnp.float32)
    # big: (H_max*LANES, C_pad); row = t*LANES + b*m + r, col = output channel.

    msk = mask_ref[...]
    acc = jnp.full((LANES, C_pad), jnp.finfo(jnp.float32).min, dtype=jnp.float32)
    # AdaptiveMaxPool2d over time (identity for the global branch): every
    # output column has exactly one [s, e) time window, encoded in `msk`.
    for t in range(H_max):
        cand = big[t * LANES:(t + 1) * LANES, :]            # sublane-aligned slice
        acc = jnp.where(msk[t:t + 1, :] > 0.0, jnp.maximum(acc, cand), acc)

    out = jnp.tanh(jnp.tanh(acc + b_ref[...]))              # branch tanh + outer tanh
    out_ref[0] = out                                        # one lane-dense store


# ---------------------------------------------------------------------------
# Host-side parameter / activation packing
# ---------------------------------------------------------------------------
def _fold_branch(p, eps=1e-5):
    """Fold eval-mode BatchNorm into the conv weight/bias.

    PyTorch conv weight (k, nfeat, ks, 1) -> (k, nfeat, ks) scaled; bias (k,).
    """
    w, b, gamma, beta, mean, var = p
    scale = gamma / jnp.sqrt(var + eps)                               # (k,)
    w_eff = (w[..., 0] * scale[:, None, None]).astype(jnp.float32)    # (k, nfeat, ks)
    b_eff = (b * scale + beta - mean * scale).astype(jnp.float32)     # (k,)
    return w_eff, b_eff


def _prepare_weights(params, *, k, hidP, nfeat, P, dil, eps=1e-5):
    """Build the (K_tot, C_pad) block weight + (1, C_pad) bias row."""
    pooled = (("l1", 3, 1), ("l2", 5, 1), ("p1", 3, dil), ("p2", 5, dil))
    K_tot = nfeat * sum(ks for _, ks, _ in pooled) + nfeat * P
    C_total = 4 * k * hidP + k
    C_pad = _ceil_div(C_total, 128) * 128

    W = jnp.zeros((K_tot, C_pad), jnp.float32)
    bias = jnp.zeros((C_pad,), jnp.float32)
    row_off = col_off = 0
    for name, ks, _ in pooled:
        w_eff, b_eff = _fold_branch(params[name], eps)       # (k, nfeat, ks), (k,)
        # rows (j*nfeat + c), cols (o*hidP + i): same weight for every bin i.
        # NOTE: at hidP=2 this hidP-fold column expansion is free (it lives in
        # the padded 128-wide N dim); revisit for hidP >= 4 / C_total > 128.
        blk = jnp.transpose(w_eff, (2, 1, 0)).reshape(ks * nfeat, k)
        blk = jnp.repeat(blk, hidP, axis=1)                  # (ks*nfeat, k*hidP)
        W = W.at[row_off:row_off + ks * nfeat,
                 col_off:col_off + k * hidP].set(blk)
        bias = bias.at[col_off:col_off + k * hidP].set(jnp.repeat(b_eff, hidP))
        row_off += ks * nfeat
        col_off += k * hidP

    wg_eff, bg_eff = _fold_branch(params["g"], eps)          # (k, nfeat, P), (k,)
    W = W.at[row_off:row_off + nfeat * P,
             col_off:col_off + k].set(wg_eff.reshape(k, nfeat * P).T)
    bias = bias.at[col_off:col_off + k].set(bg_eff)
    return W, bias.reshape(1, C_pad), C_total, C_pad, K_tot


def _build_mask(*, P, k, hidP, dil, H_max, C_total, C_pad):
    """(H_max, C_pad) mask: mask[t, c] = 1 iff time t is in channel c's bin."""
    mask = np.zeros((H_max, C_pad), np.float32)
    col = 0
    for ks, d in ((3, 1), (5, 1), (3, dil), (5, dil)):
        H_out = P - d * (ks - 1)
        for _o in range(k):
            for i in range(hidP):
                s = (i * H_out) // hidP
                e = _ceil_div((i + 1) * H_out, hidP)
                mask[s:e, col] = 1.0
                col += 1
    for _o in range(k):                                       # global branch: t=0 only
        mask[0, col] = 1.0
        col += 1
    assert col == C_total
    mask[0, C_total:] = 1.0                                   # pad cols pick the 0 row
    return jnp.asarray(mask)


def _build_im2col(x, *, nb, B_blk, nfeat, P, m, dil, H_max):
    """Shift-stacked activations: (nb, H_max*B_blk*m, K_tot).

    Row = (t, b, r); columns are [l1 taps | l2 taps | p1 taps | p2 taps | global],
    matching the weight-row layout of _prepare_weights.
    """
    x5 = x.reshape(nb, B_blk, nfeat, P, m)
    xg = jnp.transpose(x5, (0, 3, 1, 4, 2))                  # (nb, P, B_blk, m, nfeat)
    parts = []
    for ks, d in ((3, 1), (5, 1), (3, dil), (5, dil)):
        H_out = P - d * (ks - 1)
        taps = []
        for j in range(ks):
            sl = xg[:, j * d:j * d + H_out]                   # (nb, H_out, B_blk, m, nfeat)
            sl = jnp.pad(sl, ((0, 0), (0, H_max - H_out), (0, 0), (0, 0), (0, 0)))
            taps.append(sl)
        br = jnp.stack(taps, axis=4)                          # (nb, H_max, B_blk, m, ks, nfeat)
        parts.append(br.reshape(nb, H_max, B_blk, m, ks * nfeat))
    # Global branch (kernel_size=P, H_out=1): only the t=0 rows are non-zero.
    g = jnp.transpose(x5, (0, 1, 4, 2, 3)).reshape(nb, 1, B_blk, m, nfeat * P)
    g = jnp.pad(g, ((0, 0), (0, H_max - 1), (0, 0), (0, 0), (0, 0)))
    parts.append(g)
    Xb = jnp.concatenate(parts, axis=-1)                      # (nb, H_max, B_blk, m, K_tot)
    return Xb.reshape(nb, H_max * B_blk * m, Xb.shape[-1])


def _pick_b_blk(B, m, max_lanes=4096):
    """Largest divisor of B that keeps B_blk*m modest, preferring 128-aligned."""
    divisors = [d for d in range(1, B + 1) if B % d == 0 and d * m <= max_lanes]
    if not divisors:
        return 1
    aligned = [d for d in divisors if (d * m) % 128 == 0]
    return max(aligned) if aligned else max(divisors)


# ---------------------------------------------------------------------------
# Public wrapper
# ---------------------------------------------------------------------------
def region_aware_conv(x, params, *, k, hidP, dilation_factor=2):
    B, nfeat, P, m = x.shape

    for ks, d in ((3, 1), (5, 1), (3, dilation_factor), (5, dilation_factor), (P, 1)):
        if P - d * (ks - 1) < 1:
            raise ValueError(f"P={P} too small for kernel_size={ks}, dilation={d}")

    B_blk = _pick_b_blk(B, m)
    nb = B // B_blk
    LANES = B_blk * m
    H_max = P - 2                                            # largest pooled conv length

    W, bias_row, C_total, C_pad, K_tot = _prepare_weights(
        params, k=k, hidP=hidP, nfeat=nfeat, P=P, dil=dilation_factor)
    mask = _build_mask(P=P, k=k, hidP=hidP, dil=dilation_factor,
                       H_max=H_max, C_total=C_total, C_pad=C_pad)
    X_big = _build_im2col(x, nb=nb, B_blk=B_blk, nfeat=nfeat, P=P, m=m,
                          dil=dilation_factor, H_max=H_max)

    kernel = functools.partial(_region_aware_conv_kernel,
                               H_max=H_max, LANES=LANES, C_pad=C_pad)

    out = pl.pallas_call(
        kernel,
        out_shape=jax.ShapeDtypeStruct((nb, LANES, C_pad), jnp.float32),
        grid=(nb,),
        in_specs=[
            pl.BlockSpec((1, H_max * LANES, K_tot), lambda b: (b, 0, 0)),
            pl.BlockSpec((K_tot, C_pad), lambda b: (0, 0)),
            pl.BlockSpec((H_max, C_pad), lambda b: (0, 0)),
            pl.BlockSpec((1, C_pad), lambda b: (0, 0)),
        ],
        out_specs=pl.BlockSpec((1, LANES, C_pad), lambda b: (b, 0, 0)),
        compiler_params=pltpu.CompilerParams(dimension_semantics=("parallel",)),
    )(X_big, W, mask, bias_row)

    # (nb, B_blk*m, C_pad) -> (B, m, C_total); the permute(0,2,1) is already
    # done in-kernel (positions-major dot orientation).
    return out.reshape(B, m, C_pad)[:, :, :C_total]


# ---------------------------------------------------------------------------
# Deterministic params + pure-JAX reference
# ---------------------------------------------------------------------------
def init_params(key, nfeat, P, k):
    """Deterministic parameter init for all 5 ConvBranch sub-modules."""
    branches = {"l1": 3, "l2": 5, "p1": 3, "p2": 5, "g": P}
    params = {}
    for name, ks in branches.items():
        key, kw, kb, kg, kbe, km, kv = jax.random.split(key, 7)
        fan_in = nfeat * ks
        w = jax.random.normal(kw, (k, nfeat, ks, 1), jnp.float32) / jnp.sqrt(fan_in)
        b = jax.random.normal(kb, (k,), jnp.float32) * 0.1
        gamma = jax.random.uniform(kg, (k,), jnp.float32, 0.8, 1.2)
        beta = jax.random.normal(kbe, (k,), jnp.float32) * 0.1
        mean = jax.random.normal(km, (k,), jnp.float32) * 0.1
        var = jax.random.uniform(kv, (k,), jnp.float32, 0.5, 1.5)
        params[name] = (w, b, gamma, beta, mean, var)
    return params


def reference(x, params, *, k, hidP, dilation_factor=2, eps=1e-5):
    """Pure-JAX replica of the PyTorch forward (eval-mode BN) for checking."""
    B, nfeat, P, m = x.shape

    def branch(name, ks, d, pool):
        w, b, gamma, beta, mean, var = params[name]
        H_out = P - d * (ks - 1)
        y = jnp.zeros((B, k, H_out, m), jnp.float32)
        for j in range(ks):
            y = y + jnp.einsum("oc,bchm->bohm", w[:, :, j, 0],
                               x[:, :, j * d: j * d + H_out, :])
        y = y + b[None, :, None, None]
        y = (y - mean[None, :, None, None]) / jnp.sqrt(var[None, :, None, None] + eps)
        y = y * gamma[None, :, None, None] + beta[None, :, None, None]
        if pool:
            bins = []
            for i in range(hidP):
                s = (i * H_out) // hidP
                e = _ceil_div((i + 1) * H_out, hidP)
                bins.append(jnp.max(y[:, :, s:e, :], axis=2))
            y = jnp.stack(bins, axis=2)
        y = y.reshape(B, -1, m)
        return jnp.tanh(y)

    xl1 = branch("l1", 3, 1, True)
    xl2 = branch("l2", 5, 1, True)
    xp1 = branch("p1", 3, dilation_factor, True)
    xp2 = branch("p2", 5, dilation_factor, True)
    xg = branch("g", P, 1, False)
    xcat = jnp.concatenate([xl1, xl2, xp1, xp2, xg], axis=1)
    return jnp.transpose(jnp.tanh(xcat), (0, 2, 1))


if __name__ == "__main__":
    # Small shapes consistent with the module: nfeat input features, window P,
    # m regions, k conv channels, hidP pooled bins.
    B, nfeat, P, m = 2, 4, 12, 16
    k, hidP, dilation_factor = 8, 2, 2

    key = jax.random.PRNGKey(0)
    key, kx = jax.random.split(key)
    x = jax.random.normal(kx, (B, nfeat, P, m), jnp.float32)
    params = init_params(key, nfeat, P, k)

    out = region_aware_conv(x, params, k=k, hidP=hidP,
                            dilation_factor=dilation_factor)
    out = jax.block_until_ready(out)

    ref = reference(x, params, k=k, hidP=hidP, dilation_factor=dilation_factor)
    assert out.shape == (B, m, 4 * k * hidP + k), out.shape
    err = float(jnp.max(jnp.abs(out - ref)))
    assert err < 1e-3, f"max abs err {err}"
    print("KERNEL_OK")
</pallas_src>

<mosaic_0001>
module attributes {stable_mosaic.version = 11 : i64} {
  func.func @_region_aware_conv_kernel(%arg0: i32, %arg1: memref<1x320x112xf32, #tpu.memory_space<vmem>>, %arg2: memref<112x128xf32, #tpu.memory_space<vmem>>, %arg3: memref<10x128xf32, #tpu.memory_space<vmem>>, %arg4: memref<1x128xf32, #tpu.memory_space<vmem>>, %arg5: memref<1x32x128xf32, #tpu.memory_space<vmem>>) attributes {dimension_semantics = [#tpu.dimension_semantics<parallel>], iteration_bounds = array<i64: 1>, scalar_prefetch = 0 : i64, scratch_operands = 0 : i64, tpu.core_type = #tpu.core_type<tc>, window_params = [{transform_indices = @transform_0, window_bounds = array<i64: 1, 320, 112>}, {pipeline_mode = #tpu.pipeline_mode<synchronous>, transform_indices = @transform_1, window_bounds = array<i64: 112, 128>}, {pipeline_mode = #tpu.pipeline_mode<synchronous>, transform_indices = @transform_2, window_bounds = array<i64: 10, 128>}, {pipeline_mode = #tpu.pipeline_mode<synchronous>, transform_indices = @transform_3, window_bounds = array<i64: 1, 128>}, {transform_indices = @transform_4, window_bounds = array<i64: 1, 32, 128>}]} {
    %c0 = arith.constant 0 : index
    %c0_0 = arith.constant 0 : index
    %c0_1 = arith.constant 0 : index
    %0 = vector.load %arg1[%c0, %c0_0, %c0_1] : memref<1x320x112xf32, #tpu.memory_space<vmem>>, vector<1x320x112xf32>
    %1 = vector.shape_cast %0 : vector<1x320x112xf32> to vector<320x112xf32>
    %c0_2 = arith.constant 0 : index
    %c0_3 = arith.constant 0 : index
    %2 = vector.load %arg2[%c0_2, %c0_3] : memref<112x128xf32, #tpu.memory_space<vmem>>, vector<112x128xf32>
    %cst = arith.constant dense<0.000000e+00> : vector<320x128xf32>
    %3 = tpu.matmul %1, %2, %cst {dimension_numbers = #tpu.dot_dimension_numbers<[1], [0], [0], [1], [0, 0, 1, 1], [], []>} : vector<320x112xf32>, vector<112x128xf32>, vector<320x128xf32> -> vector<320x128xf32>
    %c0_4 = arith.constant 0 : index
    %c0_5 = arith.constant 0 : index
    %4 = vector.load %arg3[%c0_4, %c0_5] : memref<10x128xf32, #tpu.memory_space<vmem>>, vector<10x128xf32>
    %cst_6 = arith.constant -3.40282347E+38 : f32
    %5 = vector.broadcast %cst_6 : f32 to vector<32x128xf32>
    %6 = vector.extract_strided_slice %3 {offsets = [0, 0], sizes = [32, 128], strides = [1, 1]} : vector<320x128xf32> to vector<32x128xf32>
    %7 = vector.extract_strided_slice %4 {offsets = [0, 0], sizes = [1, 128], strides = [1, 1]} : vector<10x128xf32> to vector<1x128xf32>
    %cst_7 = arith.constant 0.000000e+00 : f32
    %8 = vector.broadcast %cst_7 : f32 to vector<1x128xf32>
    %9 = arith.cmpf ogt, %7, %8 : vector<1x128xf32>
    %10 = arith.maximumf %5, %6 : vector<32x128xf32>
    %11 = vector.shape_cast %9 : vector<1x128xi1> to vector<1x128xi1>
    %12 = vector.broadcast %11 : vector<1x128xi1> to vector<32x128xi1>
    %13 = arith.select %12, %10, %5 : vector<32x128xi1>, vector<32x128xf32>
    %14 = vector.extract_strided_slice %3 {offsets = [32, 0], sizes = [32, 128], strides = [1, 1]} : vector<320x128xf32> to vector<32x128xf32>
    %15 = vector.extract_strided_slice %4 {offsets = [1, 0], sizes = [1, 128], strides = [1, 1]} : vector<10x128xf32> to vector<1x128xf32>
    %cst_8 = arith.constant 0.000000e+00 : f32
    %16 = vector.broadcast %cst_8 : f32 to vector<1x128xf32>
    %17 = arith.cmpf ogt, %15, %16 : vector<1x128xf32>
    %18 = arith.maximumf %13, %14 : vector<32x128xf32>
    %19 = vector.shape_cast %17 : vector<1x128xi1> to vector<1x128xi1>
    %20 = vector.broadcast %19 : vector<1x128xi1> to vector<32x128xi1>
    %21 = arith.select %20, %18, %13 : vector<32x128xi1>, vector<32x128xf32>
    %22 = vector.extract_strided_slice %3 {offsets = [64, 0], sizes = [32, 128], strides = [1, 1]} : vector<320x128xf32> to vector<32x128xf32>
    %23 = vector.extract_strided_slice %4 {offsets = [2, 0], sizes = [1, 128], strides = [1, 1]} : vector<10x128xf32> to vector<1x128xf32>
    %cst_9 = arith.constant 0.000000e+00 : f32
    %24 = vector.broadcast %cst_9 : f32 to vector<1x128xf32>
    %25 = arith.cmpf ogt, %23, %24 : vector<1x128xf32>
    %26 = arith.maximumf %21, %22 : vector<32x128xf32>
    %27 = vector.shape_cast %25 : vector<1x128xi1> to vector<1x128xi1>
    %28 = vector.broadcast %27 : vector<1x128xi1> to vector<32x128xi1>
    %29 = arith.select %28, %26, %21 : vector<32x128xi1>, vector<32x128xf32>
    %30 = vector.extract_strided_slice %3 {offsets = [96, 0], sizes = [32, 128], strides = [1, 1]} : vector<320x128xf32> to vector<32x128xf32>
    %31 = vector.extract_strided_slice %4 {offsets = [3, 0], sizes = [1, 128], strides = [1, 1]} : vector<10x128xf32> to vector<1x128xf32>
    %cst_10 = arith.constant 0.000000e+00 : f32
    %32 = vector.broadcast %cst_10 : f32 to vector<1x128xf32>
    %33 = arith.cmpf ogt, %31, %32 : vector<1x128xf32>
    %34 = arith.maximumf %29, %30 : vector<32x128xf32>
    %35 = vector.shape_cast %33 : vector<1x128xi1> to vector<1x128xi1>
    %36 = vector.broadcast %35 : vector<1x128xi1> to vector<32x128xi1>
    %37 = arith.select %36, %34, %29 : vector<32x128xi1>, vector<32x128xf32>
    %38 = vector.extract_strided_slice %3 {offsets = [128, 0], sizes = [32, 128], strides = [1, 1]} : vector<320x128xf32> to vector<32x128xf32>
    %39 = vector.extract_strided_slice %4 {offsets = [4, 0], sizes = [1, 128], strides = [1, 1]} : vector<10x128xf32> to vector<1x128xf32>
    %cst_11 = arith.constant 0.000000e+00 : f32
    %40 = vector.broadcast %cst_11 : f32 to vector<1x128xf32>
    %41 = arith.cmpf ogt, %39, %40 : vector<1x128xf32>
    %42 = arith.maximumf %37, %38 : vector<32x128xf32>
    %43 = vector.shape_cast %41 : vector<1x128xi1> to vector<1x128xi1>
    %44 = vector.broadcast %43 : vector<1x128xi1> to vector<32x128xi1>
    %45 = arith.select %44, %42, %37 : vector<32x128xi1>, vector<32x128xf32>
    %46 = vector.extract_strided_slice %3 {offsets = [160, 0], sizes = [32, 128], strides = [1, 1]} : vector<320x128xf32> to vector<32x128xf32>
    %47 = vector.extract_strided_slice %4 {offsets = [5, 0], sizes = [1, 128], strides = [1, 1]} : vector<10x128xf32> to vector<1x128xf32>
    %cst_12 = arith.constant 0.000000e+00 : f32
    %48 = vector.broadcast %cst_12 : f32 to vector<1x128xf32>
    %49 = arith.cmpf ogt, %47, %48 : vector<1x128xf32>
    %50 = arith.maximumf %45, %46 : vector<32x128xf32>
    %51 = vector.shape_cast %49 : vector<1x128xi1> to vector<1x128xi1>
    %52 = vector.broadcast %51 : vector<1x128xi1> to vector<32x128xi1>
    %53 = arith.select %52, %50, %45 : vector<32x128xi1>, vector<32x128xf32>
    %54 = vector.extract_strided_slice %3 {offsets = [192, 0], sizes = [32, 128], strides = [1, 1]} : vector<320x128xf32> to vector<32x128xf32>
    %55 = vector.extract_strided_slice %4 {offsets = [6, 0], sizes = [1, 128], strides = [1, 1]} : vector<10x128xf32> to vector<1x128xf32>
    %cst_13 = arith.constant 0.000000e+00 : f32
    %56 = vector.broadcast %cst_13 : f32 to vector<1x128xf32>
    %57 = arith.cmpf ogt, %55, %56 : vector<1x128xf32>
    %58 = arith.maximumf %53, %54 : vector<32x128xf32>
    %59 = vector.shape_cast %57 : vector<1x128xi1> to vector<1x128xi1>
    %60 = vector.broadcast %59 : vector<1x128xi1> to vector<32x128xi1>
    %61 = arith.select %60, %58, %53 : vector<32x128xi1>, vector<32x128xf32>
    %62 = vector.extract_strided_slice %3 {offsets = [224, 0], sizes = [32, 128], strides = [1, 1]} : vector<320x128xf32> to vector<32x128xf32>
    %63 = vector.extract_strided_slice %4 {offsets = [7, 0], sizes = [1, 128], strides = [1, 1]} : vector<10x128xf32> to vector<1x128xf32>
    %cst_14 = arith.constant 0.000000e+00 : f32
    %64 = vector.broadcast %cst_14 : f32 to vector<1x128xf32>
    %65 = arith.cmpf ogt, %63, %64 : vector<1x128xf32>
    %66 = arith.maximumf %61, %62 : vector<32x128xf32>
    %67 = vector.shape_cast %65 : vector<1x128xi1> to vector<1x128xi1>
    %68 = vector.broadcast %67 : vector<1x128xi1> to vector<32x128xi1>
    %69 = arith.select %68, %66, %61 : vector<32x128xi1>, vector<32x128xf32>
    %70 = vector.extract_strided_slice %3 {offsets = [256, 0], sizes = [32, 128], strides = [1, 1]} : vector<320x128xf32> to vector<32x128xf32>
    %71 = vector.extract_strided_slice %4 {offsets = [8, 0], sizes = [1, 128], strides = [1, 1]} : vector<10x128xf32> to vector<1x128xf32>
    %cst_15 = arith.constant 0.000000e+00 : f32
    %72 = vector.broadcast %cst_15 : f32 to vector<1x128xf32>
    %73 = arith.cmpf ogt, %71, %72 : vector<1x128xf32>
    %74 = arith.maximumf %69, %70 : vector<32x128xf32>
    %75 = vector.shape_cast %73 : vector<1x128xi1> to vector<1x128xi1>
    %76 = vector.broadcast %75 : vector<1x128xi1> to vector<32x128xi1>
    %77 = arith.select %76, %74, %69 : vector<32x128xi1>, vector<32x128xf32>
    %78 = vector.extract_strided_slice %3 {offsets = [288, 0], sizes = [32, 128], strides = [1, 1]} : vector<320x128xf32> to vector<32x128xf32>
    %79 = vector.extract_strided_slice %4 {offsets = [9, 0], sizes = [1, 128], strides = [1, 1]} : vector<10x128xf32> to vector<1x128xf32>
    %cst_16 = arith.constant 0.000000e+00 : f32
    %80 = vector.broadcast %cst_16 : f32 to vector<1x128xf32>
    %81 = arith.cmpf ogt, %79, %80 : vector<1x128xf32>
    %82 = arith.maximumf %77, %78 : vector<32x128xf32>
    %83 = vector.shape_cast %81 : vector<1x128xi1> to vector<1x128xi1>
    %84 = vector.broadcast %83 : vector<1x128xi1> to vector<32x128xi1>
    %85 = arith.select %84, %82, %77 : vector<32x128xi1>, vector<32x128xf32>
    %c0_17 = arith.constant 0 : index
    %c0_18 = arith.constant 0 : index
    %86 = vector.load %arg4[%c0_17, %c0_18] : memref<1x128xf32, #tpu.memory_space<vmem>>, vector<1x128xf32>
    %87 = vector.broadcast %86 : vector<1x128xf32> to vector<32x128xf32>
    %88 = arith.addf %85, %87 : vector<32x128xf32>
    %89 = math.tanh %88 : vector<32x128xf32>
    %90 = math.tanh %89 : vector<32x128xf32>
    %c0_19 = arith.constant 0 : index
    %c0_20 = arith.constant 0 : index
    %c0_21 = arith.constant 0 : index
    %91 = vector.load %arg5[%c0_19, %c0_20, %c0_21] : memref<1x32x128xf32, #tpu.memory_space<vmem>>, vector<1x32x128xf32>
    %92 = vector.shape_cast %91 : vector<1x32x128xf32> to vector<32x128xf32>
    %93 = vector.shape_cast %90 : vector<32x128xf32> to vector<1x32x128xf32>
    tpu.vector_store %arg5[%c0_19, %c0_20, %c0_21], %93 {strides = array<i32>} : memref<1x32x128xf32, #tpu.memory_space<vmem>>, vector<1x32x128xf32>,
    return
  }
  func.func @transform_0(%arg0: i32) -> (i32, i32, i32) {
    %c0_i32 = arith.constant 0 : i32
    %c0_i32_0 = arith.constant 0 : i32
    %c0_i32_1 = arith.constant 0 : i32
    return %arg0, %c0_i32, %c0_i32_0 : i32, i32, i32
  }
  func.func @transform_1(%arg0: i32) -> (i32, i32) {
    %c0_i32 = arith.constant 0 : i32
    %c0_i32_0 = arith.constant 0 : i32
    %c0_i32_1 = arith.constant 0 : i32
    return %c0_i32, %c0_i32_0 : i32, i32
  }
  func.func @transform_2(%arg0: i32) -> (i32, i32) {
    %c0_i32 = arith.constant 0 : i32
    %c0_i32_0 = arith.constant 0 : i32
    %c0_i32_1 = arith.constant 0 : i32
    return %c0_i32, %c0_i32_0 : i32, i32
  }
  func.func @transform_3(%arg0: i32) -> (i32, i32) {
    %c0_i32 = arith.constant 0 : i32
    %c0_i32_0 = arith.constant 0 : i32
    %c0_i32_1 = arith.constant 0 : i32
    return %c0_i32, %c0_i32_0 : i32, i32
  }
  func.func @transform_4(%arg0: i32) -> (i32, i32, i32) {
    %c0_i32 = arith.constant 0 : i32
    %c0_i32_0 = arith.constant 0 : i32
    %c0_i32_1 = arith.constant 0 : i32
    return %arg0, %c0_i32, %c0_i32_0 : i32, i32, i32
  }
}

</mosaic_0001>

<bundles_post_ra>
// kernel: tpu_custom_call.1
= control target key start
LH: loop header
LB: loop body
LE: loop exit
PB: predicated region body
PF: predicated region fallthrough
CT: control target
= control target key end

     0   :  { %9 = vsyncpa [#allocation3], 0  ;;  %s1278_s0 = inlined_call_operand.hbm [shape: f32[1,320,112], index: 0, kind: input, shape index: {}]   ;;  %s1279_s1 = inlined_call_operand.hbm [shape: f32[112,128], index: 1, kind: input, shape index: {}]   ;;  %s1280_s2 = inlined_call_operand.hbm [shape: f32[10,128], index: 2, kind: input, shape index: {}]   ;;  %s1281_s3 = inlined_call_operand.vmem [shape: f32[1,128], index: 3, kind: input, shape index: {}]   ;;  %s1282_s4 = inlined_call_operand.hbm [shape: f32[1,32,128], index: 4, kind: output, shape index: {}]  }
   0x1   :  { %10 = vsyncpa [#allocation6], 0 }
   0x2   :  { %11 = vsyncpa [#allocation4], 0  ;;  %s1018_s15 = smov [#allocation5]   ;;  %s1019_s17 = smov [#allocation2]  }
   0x3   :  { %s29_s16 = sshll.u32 %s1018_s15, 4  ;;  %s17_s18 = sshll.u32 %s1019_s17, 4  ;;  %s30_s16 = int_to_ptr.vmem [resolvable:$true] %s29_s16  ;;  %s1050_s18 = int_to_ptr.vmem [resolvable:$true] %s17_s18 }
   0x4   :  { %s924_s21 = scalar_lea.hbm %s1279_s1, 1792 }
   0x5   :  { %p925_p0 = scmp.ne.s32.totalorder %s1279_s1, %s924_s21  ;;  %p928_p1 = scmp.lt.u32.totalorder %s924_s21, %s1279_s1 }
   0x7   :  { %p930_p2 = pnand %p928_p1, %p925_p0 }
   0x9   :  { %933 = shalt.err (!%p930_p2)
}
   0xa   :  { %s934_s26 = scalar_lea.vmem %s30_s16, 1792  ;;  %p939_p4 = scmp.lt.s32.totalorder %s30_s16, %s30_s16 }
   0xb   :  { %p935_p3 = scmp.ne.s32.totalorder %s30_s16, %s934_s26  ;;  %p940_p5 = scmp.lt.s32.totalorder %s934_s26, %s934_s26 }
   0xd   :  { %p941_p6 = por %p940_p5, %p939_p4 }
   0xf   :  { %p942_p7 = pnand %p941_p6, %p935_p3 }
  0x11   :  { %945 = shalt.err (!%p942_p7)
}
  0x12   :  { %s1020_s27 = smov 128   ;;  %s1021_s28 = smov 8  }
  0x13   :  { %35 = dma.hbm_to_vmem [thread:$0]  %s1279_s1, 1792, %s30_s16, [#allocation6], %s1020_s27, %s1020_s27, %s1021_s28  }
  0x14   :  { %s946_s7 = scalar_lea.hbm %s1278_s0, 5120 }
  0x15   :  { %p947_p8 = scmp.ne.s32.totalorder %s1278_s0, %s946_s7  ;;  %p950_p9 = scmp.lt.u32.totalorder %s946_s7, %s1278_s0 }
  0x17   :  { %p952_p10 = pnand %p950_p9, %p947_p8 }
  0x19   :  { %955 = shalt.err (!%p952_p10)
}
  0x1a   :  { %s956_s12 = scalar_lea.vmem %s1050_s18, 5120  ;;  %p961_p12 = scmp.lt.s32.totalorder %s1050_s18, %s1050_s18 }
  0x1b   :  { %p957_p11 = scmp.ne.s32.totalorder %s1050_s18, %s956_s12  ;;  %p962_p13 = scmp.lt.s32.totalorder %s956_s12, %s956_s12 }
  0x1d   :  { %p963_p0 = por %p962_p13, %p961_p12 }
  0x1f   :  { %p964_p1 = pnand %p963_p0, %p957_p11 }
  0x21   :  { %967 = shalt.err (!%p964_p1)
}
  0x22   :  { %23 = dma.hbm_to_vmem [thread:$0]  %s1278_s0, 5120, %s1050_s18, [#allocation3], %s1020_s27, %s1020_s27, %s1021_s28  }
  0x23   :  { %s1022_s14 = smov [#allocation7]   ;;  %s968_s19 = scalar_lea.hbm %s1280_s2, 256 }
  0x24   :  { %s41_s15 = sshll.u32 %s1022_s14, 4  ;;  %p969_p2 = scmp.ne.s32.totalorder %s1280_s2, %s968_s19  ;;  %s42_s15 = int_to_ptr.vmem [resolvable:$true] %s41_s15 }
  0x25   :  { %p972_p3 = scmp.lt.u32.totalorder %s968_s19, %s1280_s2 }
  0x27   :  { %p974_p4 = pnand %p972_p3, %p969_p2 }
  0x29   :  { %977 = shalt.err (!%p974_p4)
}
  0x2a   :  { %s978_s24 = scalar_lea.vmem %s42_s15, 256  ;;  %p983_p6 = scmp.lt.s32.totalorder %s42_s15, %s42_s15 }
  0x2b   :  { %p979_p5 = scmp.ne.s32.totalorder %s42_s15, %s978_s24  ;;  %p984_p7 = scmp.lt.s32.totalorder %s978_s24, %s978_s24 }
  0x2d   :  { %p985_p8 = por %p984_p7, %p983_p6 }
  0x2f   :  { %p986_p9 = pnand %p985_p8, %p979_p5 }
  0x31   :  { %989 = shalt.err (!%p986_p9)
}
  0x32   :  { %47 = dma.hbm_to_vmem [thread:$0]  %s1280_s2, 256, %s42_s15, [#allocation6], %s1020_s27, %s1020_s27, %s1021_s28  }
  0x33   :  { %1012 = dma.done.wait [#allocation3], 5120  }
  0x34   :  { %1013 = vsyncadd [#allocation3], 4294962176 }
  0x35   :  { %1014 = dma.done.wait [#allocation6], 2048  }
  0x36   :  { %1015 = vsyncadd [#allocation6], 4294965248  ;;  %v99_v0 = vld [vmem:[#allocation5] sm:$0xff]  ;;  %v100_v1 = vld [vmem:[#allocation5 + $0x8] sm:$0xff]  ;;  %vm113_vm0 = vcmask 916480   ;;  %v507_v61 = vlaneseq }
  0x37   :  { %v101_v2 = vld [vmem:[#allocation5 + $0x10] sm:$0xff]  ;;  %v859_v3 = vpack.c.bf16 %v100_v1, %v99_v0  ;;  %v102_v4 = vld [vmem:[#allocation5 + $0x18] sm:$0xff]  ;;  %v103_v6 = vld [vmem:[#allocation5 + $0x20] sm:$0xff]  ;;  %v1023_v1 = vmov 0  }
  0x38   :  { %v863_v5 = vpack.c.bf16 %v102_v4, %v101_v2  ;;  %v104_v7 = vld [vmem:[#allocation5 + $0x28] sm:$0xff]  ;;  %v59_v8 = vld [vmem:[#allocation2] sm:$0xff]  ;;  %v105_v10 = vld [vmem:[#allocation5 + $0x30] sm:$0xff]  ;;  %v1142_v63 = vshrl.u32 %v507_v61, 7 }
  0x39   :  { %860 = vmatprep.subr.bf16.mxu0 %v859_v3  ;;  %887 = vmatprep.subr.bf16.mxu1 %v859_v3  ;;  %v867_v9 = vpack.c.bf16 %v104_v7, %v103_v6  ;;  %v106_v11 = vld [vmem:[#allocation5 + $0x38] sm:$0xff]  ;;  %v79_v12 = vld [vmem:[#allocation2 + $0xa0] sm:$0xff]  ;;  %v108_v15 = vld [vmem:[#allocation5 + $0x48] sm:$0xff] }
  0x3a   :  { %862 = vmatpush3.bf16.msra.mxu0 %v859_v3  ;;  %894 = vmatpush3.bf16.msra.mxu1 %v859_v3  ;;  %v871_v13 = vpack.c.bf16 %v106_v11, %v105_v10  ;;  %v107_v14 = vld [vmem:[#allocation5 + $0x40] sm:$0xff]  ;;  %v109_v17 = vld [vmem:[#allocation5 + $0x50] sm:$0xff]  ;;  %v110_v18 = vld [vmem:[#allocation5 + $0x58] sm:$0xff]  ;;  %v509_v0 = vsub.s32 0, %v1142_v63  ;;  %v522_v3 = vsub.s32 1, %v1142_v63 }
  0x3b   :  { %864 = vmatprep.subr.bf16.mxu0 %v863_v5  ;;  %888 = vmatprep.subr.bf16.mxu1 %v863_v5  ;;  %v875_v16 = vpack.c.bf16 %v108_v15, %v107_v14  ;;  %v879_v19 = vpack.c.bf16 %v110_v18, %v109_v17  ;;  %v111_v20 = vld [vmem:[#allocation5 + $0x60] sm:$0xff]  ;;  %v112_v21 = vld [vmem:[#allocation5 + $0x68] sm:$0xff]  ;;  %v61_v25 = vld [vmem:[#allocation2 + $0x10] sm:$0xff] }
  0x3c   :  { %799 = vmatprep.mubr.msk.f32.mxu0 %vm113_vm0, %v59_v8  ;;  %829 = vmatprep.mubr.msk.f32.mxu1 %vm113_vm0, %v79_v12  ;;  %v883_v22 = vpack.c.bf16 %v112_v21, %v111_v20  ;;  %v60_v23 = vld [vmem:[#allocation2 + $0x8] sm:$0xff]  ;;  %v81_v26 = vld [vmem:[#allocation2 + $0xb0] sm:$0xff]  ;;  %v62_v27 = vld [vmem:[#allocation2 + $0x18] sm:$0xff] }
  0x3d   :  { %v80_v24 = vld [vmem:[#allocation2 + $0xa8] sm:$0xff]  ;;  %v82_v28 = vld [vmem:[#allocation2 + $0xb8] sm:$0xff]  ;;  %v63_v29 = vld [vmem:[#allocation2 + $0x20] sm:$0xff] }
  0x3e   :  { %866 = vmatpush3.bf16.msra.mxu0 %v863_v5  ;;  %895 = vmatpush3.bf16.msra.mxu1 %v863_v5  ;;  %v83_v30 = vld [vmem:[#allocation2 + $0xc0] sm:$0xff]  ;;  %v64_v31 = vld [vmem:[#allocation2 + $0x28] sm:$0xff]  ;;  %v65_v33 = vld [vmem:[#allocation2 + $0x30] sm:$0xff] }
  0x3f   :  { %868 = vmatprep.subr.bf16.mxu0 %v867_v9  ;;  %889 = vmatprep.subr.bf16.mxu1 %v867_v9  ;;  %v84_v32 = vld [vmem:[#allocation2 + $0xc8] sm:$0xff]  ;;  %v85_v34 = vld [vmem:[#allocation2 + $0xd0] sm:$0xff]  ;;  %v66_v35 = vld [vmem:[#allocation2 + $0x38] sm:$0xff] }
  0x40   :  { %v86_v36 = vld [vmem:[#allocation2 + $0xd8] sm:$0xff]  ;;  %v67_v37 = vld [vmem:[#allocation2 + $0x40] sm:$0xff]  ;;  %v68_v39 = vld [vmem:[#allocation2 + $0x48] sm:$0xff] }
  0x41   :  { %v87_v38 = vld [vmem:[#allocation2 + $0xe0] sm:$0xff]  ;;  %v88_v40 = vld [vmem:[#allocation2 + $0xe8] sm:$0xff]  ;;  %v69_v41 = vld [vmem:[#allocation2 + $0x50] sm:$0xff] }
  0x42   :  { %870 = vmatpush3.bf16.msra.mxu0 %v867_v9  ;;  %896 = vmatpush3.bf16.msra.mxu1 %v867_v9  ;;  %v89_v42 = vld [vmem:[#allocation2 + $0xf0] sm:$0xff]  ;;  %v70_v43 = vld [vmem:[#allocation2 + $0x58] sm:$0xff]  ;;  %v71_v45 = vld [vmem:[#allocation2 + $0x60] sm:$0xff] }
  0x43   :  { %872 = vmatprep.subr.bf16.mxu0 %v871_v13  ;;  %890 = vmatprep.subr.bf16.mxu1 %v871_v13  ;;  %v90_v44 = vld [vmem:[#allocation2 + $0xf8] sm:$0xff]  ;;  %v91_v46 = vld [vmem:[#allocation2 + $0x100] sm:$0xff]  ;;  %v72_v47 = vld [vmem:[#allocation2 + $0x68] sm:$0xff] }
  0x44   :  { %v92_v48 = vld [vmem:[#allocation2 + $0x108] sm:$0xff]  ;;  %v73_v49 = vld [vmem:[#allocation2 + $0x70] sm:$0xff]  ;;  %v74_v51 = vld [vmem:[#allocation2 + $0x78] sm:$0xff] }
  0x45   :  { %v93_v50 = vld [vmem:[#allocation2 + $0x110] sm:$0xff]  ;;  %v94_v52 = vld [vmem:[#allocation2 + $0x118] sm:$0xff]  ;;  %v75_v53 = vld [vmem:[#allocation2 + $0x80] sm:$0xff] }
  0x46   :  { %874 = vmatpush3.bf16.msra.mxu0 %v871_v13  ;;  %897 = vmatpush3.bf16.msra.mxu1 %v871_v13  ;;  %v95_v54 = vld [vmem:[#allocation2 + $0x120] sm:$0xff]  ;;  %v76_v55 = vld [vmem:[#allocation2 + $0x88] sm:$0xff]  ;;  %v77_v57 = vld [vmem:[#allocation2 + $0x90] sm:$0xff] }
  0x47   :  { %876 = vmatprep.subr.bf16.mxu0 %v875_v16  ;;  %891 = vmatprep.subr.bf16.mxu1 %v875_v16  ;;  %v96_v56 = vld [vmem:[#allocation2 + $0x128] sm:$0xff]  ;;  %v97_v58 = vld [vmem:[#allocation2 + $0x130] sm:$0xff]  ;;  %v78_v59 = vld [vmem:[#allocation2 + $0x98] sm:$0xff] }
  0x48   :  { %v98_v60 = vld [vmem:[#allocation2 + $0x138] sm:$0xff]  ;;  %v499_v62 = vld [vmem:[#allocation7] sm:$0xff] }
  0x49   :  { %vm501_vm1 = vcmp.gt.f32.partialorder %v499_v62, 0.0 }
  0x4a   :  { %878 = vmatpush3.bf16.msra.mxu0 %v875_v16  ;;  %898 = vmatpush3.bf16.msra.mxu1 %v875_v16  ;;  %v1146_v2 = vsel %vm501_vm1, 1, %v1023_v1  ;;  %v535_v16 = vsub.s32 2, %v1142_v63 }
  0x4b   :  { %880 = vmatprep.subr.bf16.mxu0 %v879_v19  ;;  %892 = vmatprep.subr.bf16.mxu1 %v879_v19  ;;  %v510_v7 = vrot.slane %v1146_v2, %v509_v0  ;;  %v523_v9 = vrot.slane %v1146_v2, %v522_v3 }
  0x4d   :  { %vm511_vm2 = vcmp.eq.s32.totalorder %v510_v7, 1  ;;  %vm524_vm3 = vcmp.eq.s32.totalorder %v523_v9, 1  ;;  %v574_v9 = vsub.s32 5, %v1142_v63 }
  0x4e   :  { %882 = vmatpush3.bf16.msra.mxu0 %v879_v19  ;;  %899 = vmatpush3.bf16.msra.mxu1 %v879_v19 }
  0x4f   :  { %884 = vmatprep.subr.bf16.mxu0 %v883_v22  ;;  %893 = vmatprep.subr.bf16.mxu1 %v883_v22 }
  0x52   :  { %886 = vmatpush3.bf16.msra.mxu0 %v883_v22  ;;  %900 = vmatpush3.bf16.msra.mxu1 %v883_v22 }
  0x55   :  { %800 = vmatmul.mubr.msk.f32.vlgmr.msra.gmra.mrb[0].mxu0 %vm113_vm0, %v60_v23  ;;  %830 = vmatmul.mubr.msk.f32.vlgmr.msra.gmra.mrb[0].mxu1 %vm113_vm0, %v80_v24 }
  0x56   :  { %802 = vmatprep.mubr.msk.f32.mxu0 %vm113_vm0, %v61_v25  ;;  %832 = vmatprep.mubr.msk.f32.mxu1 %vm113_vm0, %v81_v26 }
  0x59   :  { %803 = vmatmul.mubr.msk.f32.gmra.mrb[2].mxu0 %vm113_vm0, %v62_v27  ;;  %833 = vmatmul.mubr.msk.f32.gmra.mrb[2].mxu1 %vm113_vm0, %v82_v28 }
  0x5a   :  { %805 = vmatprep.mubr.msk.f32.mxu0 %vm113_vm0, %v63_v29  ;;  %835 = vmatprep.mubr.msk.f32.mxu1 %vm113_vm0, %v83_v30 }
  0x5d   :  { %806 = vmatmul.mubr.msk.f32.gmra.mrb[4].mxu0 %vm113_vm0, %v64_v31  ;;  %836 = vmatmul.mubr.msk.f32.gmra.mrb[4].mxu1 %vm113_vm0, %v84_v32  ;;  %v536_v31 = vrot.slane %v1146_v2, %v535_v16 }
  0x5e   :  { %808 = vmatprep.mubr.msk.f32.mxu0 %vm113_vm0, %v65_v33  ;;  %838 = vmatprep.mubr.msk.f32.mxu1 %vm113_vm0, %v85_v34 }
  0x5f   :  { %vm537_vm4 = vcmp.eq.s32.totalorder %v536_v31, 1  ;;  %v600_v31 = vsub.s32 7, %v1142_v63 }
  0x61   :  { %809 = vmatmul.mubr.msk.f32.gmra.mrb[6].mxu0 %vm113_vm0, %v66_v35  ;;  %839 = vmatmul.mubr.msk.f32.gmra.mrb[6].mxu1 %vm113_vm0, %v86_v36 }
  0x62   :  { %811 = vmatprep.mubr.msk.f32.mxu0 %vm113_vm0, %v67_v37  ;;  %841 = vmatprep.mubr.msk.f32.mxu1 %vm113_vm0, %v87_v38 }
  0x65   :  { %812 = vmatmul.mubr.msk.f32.gmra.mrb[8].mxu0 %vm113_vm0, %v68_v39  ;;  %842 = vmatmul.mubr.msk.f32.gmra.mrb[8].mxu1 %vm113_vm0, %v88_v40 }
  0x66   :  { %814 = vmatprep.mubr.msk.f32.mxu0 %vm113_vm0, %v69_v41  ;;  %844 = vmatprep.mubr.msk.f32.mxu1 %vm113_vm0, %v89_v42  ;;  %v548_v42 = vsub.s32 3, %v1142_v63 }
  0x69   :  { %815 = vmatmul.mubr.msk.f32.gmra.mrb[10].mxu0 %vm113_vm0, %v70_v43  ;;  %845 = vmatmul.mubr.msk.f32.gmra.mrb[10].mxu1 %vm113_vm0, %v90_v44 }
  0x6a   :  { %817 = vmatprep.mubr.msk.f32.mxu0 %vm113_vm0, %v71_v45  ;;  %847 = vmatprep.mubr.msk.f32.mxu1 %vm113_vm0, %v91_v46 }
  0x6d   :  { %818 = vmatmul.mubr.msk.f32.gmra.mrb[12].mxu0 %vm113_vm0, %v72_v47  ;;  %848 = vmatmul.mubr.msk.f32.gmra.mrb[12].mxu1 %vm113_vm0, %v92_v48 }
  0x6e   :  { %820 = vmatprep.mubr.msk.f32.mxu0 %vm113_vm0, %v73_v49  ;;  %850 = vmatprep.mubr.msk.f32.mxu1 %vm113_vm0, %v93_v50  ;;  %v549_v50 = vrot.slane %v1146_v2, %v548_v42 }
  0x70   :  { %vm550_vm5 = vcmp.eq.s32.totalorder %v549_v50, 1 }
  0x71   :  { %821 = vmatmul.mubr.msk.f32.gmra.mrb[14].mxu0 %vm113_vm0, %v74_v51  ;;  %851 = vmatmul.mubr.msk.f32.gmra.mrb[14].mxu1 %vm113_vm0, %v94_v52 }
  0x72   :  { %823 = vmatprep.mubr.msk.f32.mxu0 %vm113_vm0, %v75_v53  ;;  %853 = vmatprep.mubr.msk.f32.mxu1 %vm113_vm0, %v95_v54 }
  0x75   :  { %824 = vmatmul.mubr.msk.f32.gmra.mrb[16].mxu0 %vm113_vm0, %v76_v55  ;;  %854 = vmatmul.mubr.msk.f32.gmra.mrb[16].mxu1 %vm113_vm0, %v96_v56 }
  0x76   :  { %826 = vmatprep.mubr.msk.f32.mxu0 %vm113_vm0, %v77_v57  ;;  %856 = vmatprep.mubr.msk.f32.mxu1 %vm113_vm0, %v97_v58 }
  0x79   :  { %827 = vmatmul.mubr.msk.f32.gmra.mrb[18].mxu0 %vm113_vm0, %v78_v59  ;;  %857 = vmatmul.mubr.msk.f32.gmra.mrb[18].mxu1 %vm113_vm0, %v98_v60  ;;  %v561_v59 = vsub.s32 4, %v1142_v63 }
 0x128   :  { %v801_v4 = vpop.f32.mrb[0].mxu0  ;;  %v1149_v5 = vpop.f32.mrb[0].mxu1 }
 0x129   :  { %v300_v6 = vpop.f32.mrb[1].mxu0  ;;  %v1154_v8 = vpop.f32.mrb[1].mxu1  ;;  %v503_v10 = vmax.f32 %v801_v4, -3.4028235e+38 }
 0x12a   :  { %v502_v13 = vmax.f32 %v300_v6, -3.4028235e+38 }
 0x12b   :  { %v513_v19 = vsel %vm511_vm2, %v503_v10, -3.4028235e+38 }
 0x12c   :  { %v804_v11 = vpop.f32.mrb[2].mxu0  ;;  %v1159_v12 = vpop.f32.mrb[2].mxu1  ;;  %v512_v24 = vsel %vm511_vm2, %v502_v13, -3.4028235e+38 }
 0x12d   :  { %v310_v14 = vpop.f32.mrb[3].mxu0  ;;  %v1161_v15 = vpop.f32.mrb[3].mxu1  ;;  %v505_v17 = vmax.f32 %v804_v11, -3.4028235e+38  ;;  %v562_v11 = vrot.slane %v1146_v2, %v561_v59 }
 0x12e   :  { %v504_v21 = vmax.f32 %v310_v14, -3.4028235e+38 }
 0x12f   :  { %v515_v29 = vsel %vm511_vm2, %v505_v17, -3.4028235e+38  ;;  %vm563_vm6 = vcmp.eq.s32.totalorder %v562_v11, 1 }
 0x130   :  { %v807_v18 = vpop.f32.mrb[4].mxu0  ;;  %v1165_v20 = vpop.f32.mrb[4].mxu1  ;;  %v514_v35 = vsel %vm511_vm2, %v504_v21, -3.4028235e+38  ;;  %v587_v21 = vsub.s32 6, %v1142_v63 }
 0x131   :  { %v517_v22 = vmax.f32 %v513_v19, %v807_v18  ;;  %v320_v23 = vpop.f32.mrb[5].mxu0  ;;  %v1168_v25 = vpop.f32.mrb[5].mxu1 }
 0x132   :  { %v516_v26 = vmax.f32 %v512_v24, %v320_v23  ;;  %v575_v23 = vrot.slane %v1146_v2, %v574_v9 }
 0x133   :  { %v526_v27 = vsel %vm524_vm3, %v517_v22, %v513_v19 }
 0x134   :  { %v810_v28 = vpop.f32.mrb[6].mxu0  ;;  %v525_v30 = vsel %vm524_vm3, %v516_v26, %v512_v24  ;;  %v1174_v32 = vpop.f32.mrb[6].mxu1  ;;  %v500_v24 = vld [vmem:[#allocation7 + $0x8] sm:$0x3]  ;;  %vm576_vm8 = vcmp.eq.s32.totalorder %v575_v23, 1 }
 0x135   :  { %v519_v33 = vmax.f32 %v515_v29, %v810_v28  ;;  %v330_v34 = vpop.f32.mrb[7].mxu0  ;;  %v1177_v36 = vpop.f32.mrb[7].mxu1  ;;  %vm607_vm7 = vcmp.gt.f32.partialorder %v500_v24, 0.0 }
 0x136   :  { %v518_v37 = vmax.f32 %v514_v35, %v330_v34 }
 0x137   :  { %v528_v38 = vsel %vm524_vm3, %v519_v33, %v515_v29 }
 0x138   :  { %v813_v39 = vpop.f32.mrb[8].mxu0  ;;  %v527_v40 = vsel %vm524_vm3, %v518_v37, %v514_v35  ;;  %v1181_v41 = vpop.f32.mrb[8].mxu1  ;;  %v588_v35 = vrot.slane %v1146_v2, %v587_v21 }
 0x139   :  { %v530_v43 = vmax.f32 %v526_v27, %v813_v39  ;;  %v340_v44 = vpop.f32.mrb[9].mxu0  ;;  %v1184_v45 = vpop.f32.mrb[9].mxu1 }
 0x13a   :  { %v529_v46 = vmax.f32 %v525_v30, %v340_v44  ;;  %vm589_vm9 = vcmp.eq.s32.totalorder %v588_v35, 1 }
 0x13b   :  { %v539_v47 = vsel %vm537_vm4, %v530_v43, %v526_v27 }
 0x13c   :  { %v816_v48 = vpop.f32.mrb[10].mxu0  ;;  %v538_v49 = vsel %vm537_vm4, %v529_v46, %v525_v30  ;;  %v1189_v51 = vpop.f32.mrb[10].mxu1 }
 0x13d   :  { %v532_v52 = vmax.f32 %v528_v38, %v816_v48  ;;  %v350_v53 = vpop.f32.mrb[11].mxu0  ;;  %v1191_v54 = vpop.f32.mrb[11].mxu1  ;;  %v612_v48 = vsel %vm607_vm7, 1, %v1023_v1 }
 0x13e   :  { %v531_v55 = vmax.f32 %v527_v40, %v350_v53  ;;  %v616_v1 = vrot.slane %v612_v48, %v509_v0  ;;  %v629_v0 = vrot.slane %v612_v48, %v522_v3 }
 0x13f   :  { %v541_v56 = vsel %vm537_vm4, %v532_v52, %v528_v38 }
 0x140   :  { %v819_v57 = vpop.f32.mrb[12].mxu0  ;;  %v540_v58 = vsel %vm537_vm4, %v531_v55, %v527_v40  ;;  %v1196_v60 = vpop.f32.mrb[12].mxu1  ;;  %vm617_vm11 = vcmp.eq.s32.totalorder %v616_v1, 1  ;;  %vm630_vm12 = vcmp.eq.s32.totalorder %v629_v0, 1 }
 0x141   :  { %v543_v61 = vmax.f32 %v539_v47, %v819_v57  ;;  %v360_v62 = vpop.f32.mrb[13].mxu0  ;;  %v1198_v4 = vpop.f32.mrb[13].mxu1 }
 0x142   :  { %v542_v6 = vmax.f32 %v538_v49, %v360_v62 }
 0x143   :  { %v552_v7 = vsel %vm550_vm5, %v543_v61, %v539_v47  ;;  %v601_v47 = vrot.slane %v1146_v2, %v600_v31 }
 0x144   :  { %v822_v10 = vpop.f32.mrb[14].mxu0  ;;  %v551_v13 = vsel %vm550_vm5, %v542_v6, %v538_v49  ;;  %v1204_v14 = vpop.f32.mrb[14].mxu1 }
 0x145   :  { %v545_v16 = vmax.f32 %v541_v56, %v822_v10  ;;  %v370_v17 = vpop.f32.mrb[15].mxu0  ;;  %v1206_v18 = vpop.f32.mrb[15].mxu1  ;;  %vm602_vm10 = vcmp.eq.s32.totalorder %v601_v47, 1 }
 0x146   :  { %v544_v19 = vmax.f32 %v540_v58, %v370_v17 }
 0x147   :  { %v554_v22 = vsel %vm550_vm5, %v545_v16, %v541_v56 }
 0x148   :  { %v825_v26 = vpop.f32.mrb[16].mxu0  ;;  %v553_v27 = vsel %vm550_vm5, %v544_v19, %v540_v58  ;;  %v855_v28 = vpop.f32.mrb[16].mxu1 }
 0x149   :  { %v556_v29 = vmax.f32 %v552_v7, %v825_v26  ;;  %v380_v30 = vpop.f32.mrb[17].mxu0  ;;  %v480_v33 = vpop.f32.mrb[17].mxu1 }
 0x14a   :  { %v555_v34 = vmax.f32 %v551_v13, %v380_v30 }
 0x14b   :  { %v565_v37 = vsel %vm563_vm6, %v556_v29, %v552_v7 }
 0x14c   :  { %v569_v38 = vmax.f32 %v565_v37, %v1149_v5  ;;  %v564_v39 = vsel %vm563_vm6, %v555_v34, %v551_v13  ;;  %v828_v40 = vpop.f32.mrb[18].mxu0  ;;  %v858_v42 = vpop.f32.mrb[18].mxu1 }
 0x14d   :  { %v568_v43 = vmax.f32 %v564_v39, %v1154_v8  ;;  %v558_v44 = vmax.f32 %v554_v22, %v828_v40  ;;  %v390_v46 = vpop.f32.mrb[19].mxu0  ;;  %v490_v49 = vpop.f32.mrb[19].mxu1 }
 0x14e   :  { %v557_v50 = vmax.f32 %v553_v27, %v390_v46  ;;  %v578_v52 = vsel %vm576_vm8, %v569_v38, %v565_v37 }
 0x14f   :  { %v567_v53 = vsel %vm563_vm6, %v558_v44, %v554_v22  ;;  %v582_v5 = vmax.f32 %v578_v52, %v1165_v20  ;;  %v577_v55 = vsel %vm576_vm8, %v568_v43, %v564_v39 }
 0x150   :  { %v571_v56 = vmax.f32 %v567_v53, %v1159_v12  ;;  %v566_v8 = vsel %vm563_vm6, %v557_v50, %v553_v27  ;;  %v581_v57 = vmax.f32 %v577_v55, %v1168_v25 }
 0x151   :  { %v570_v2 = vmax.f32 %v566_v8, %v1161_v15  ;;  %v591_v58 = vsel %vm589_vm9, %v582_v5, %v578_v52 }
 0x152   :  { %v595_v59 = vmax.f32 %v591_v58, %v1181_v41  ;;  %v590_v20 = vsel %vm589_vm9, %v581_v57, %v577_v55  ;;  %v580_v61 = vsel %vm576_vm8, %v571_v56, %v567_v53 }
 0x153   :  { %v594_v12 = vmax.f32 %v590_v20, %v1184_v45  ;;  %v584_v62 = vmax.f32 %v580_v61, %v1174_v32  ;;  %v579_v25 = vsel %vm576_vm8, %v570_v2, %v566_v8 }
 0x154   :  { %v604_v15 = vsel %vm602_vm10, %v595_v59, %v591_v58  ;;  %v583_v6 = vmax.f32 %v579_v25, %v1177_v36 }
 0x155   :  { %v609_v41 = vmax.f32 %v604_v15, %v1196_v60  ;;  %v603_v7 = vsel %vm602_vm10, %v594_v12, %v590_v20  ;;  %v593_v9 = vsel %vm589_vm9, %v584_v62, %v580_v61  ;;  %v716_v60 = vld [vmem:[%s1281_s3] ss:$0 sm:$0xff]  ;;  %s1024_s3 = smov [#allocation8]  }
 0x156   :  { %v608_v45 = vmax.f32 %v603_v7, %v1198_v4  ;;  %v597_v32 = vmax.f32 %v593_v9, %v1189_v51  ;;  %v592_v10 = vsel %vm589_vm9, %v583_v6, %v579_v25  ;;  %s663_s26 = sshll.u32 %s1024_s3, 4  ;;  %s664_s26 = int_to_ptr.vmem [resolvable:$true] %s663_s26 }
 0x157   :  { %v596_v63 = vmax.f32 %v592_v10, %v1191_v54  ;;  %v619_v3 = vsel %vm617_vm11, %v609_v41, %v604_v15  ;;  %s990_s29 = scalar_lea.vmem %s664_s26, 512  ;;  %p995_p11 = scmp.lt.s32.totalorder %s664_s26, %s664_s26 }
 0x158   :  { %v606_v36 = vsel %vm602_vm10, %v597_v32, %v593_v9  ;;  %v623_v11 = vmax.f32 %v619_v3, %v855_v28  ;;  %v618_v13 = vsel %vm617_vm11, %v608_v45, %v603_v7  ;;  %p991_p10 = scmp.ne.s32.totalorder %s664_s26, %s990_s29  ;;  %p996_p12 = scmp.lt.s32.totalorder %s990_s29, %s990_s29 }
 0x159   :  { %v611_v4 = vmax.f32 %v606_v36, %v1204_v14  ;;  %v605_v51 = vsel %vm602_vm10, %v596_v63, %v592_v10  ;;  %v622_v16 = vmax.f32 %v618_v13, %v480_v33 }
 0x15a   :  { %v610_v17 = vmax.f32 %v605_v51, %v1206_v18  ;;  %v632_v54 = vsel %vm630_vm12, %v623_v11, %v619_v3  ;;  %p997_p13 = por %p996_p12, %p995_p11 }
 0x15b   :  { %v643_v19 = vadd.f32 %v716_v60, %v632_v54  ;;  %v631_v21 = vsel %vm630_vm12, %v622_v16, %v618_v13  ;;  %v621_v22 = vsel %vm617_vm11, %v611_v4, %v606_v36 }
 0x15c   :  { %v642_v23 = vadd.f32 %v716_v60, %v631_v21  ;;  %v625_v24 = vmax.f32 %v621_v22, %v858_v42  ;;  %v620_v26 = vsel %vm617_vm11, %v610_v17, %v605_v51  ;;  %p998_p0 = pnand %p997_p13, %p991_p10 }
 0x15d   :  { %908 = vtanh.f32 %v643_v19  ;;  %v624_v27 = vmax.f32 %v620_v26, %v490_v49 }
 0x15e   :  { %910 = vtanh.f32 %v642_v23  ;;  %v634_v14 = vsel %vm630_vm12, %v625_v24, %v621_v22 }
 0x15f   :  { %v645_v28 = vadd.f32 %v716_v60, %v634_v14  ;;  %v633_v29 = vsel %vm630_vm12, %v624_v27, %v620_v26 }
 0x160   :  { %v644_v18 = vadd.f32 %v716_v60, %v633_v29 }
 0x161   :  { %912 = vtanh.f32 %v645_v28 }
 0x162   :  { %914 = vtanh.f32 %v644_v18 }
 0x167   :  { %v909_v30 = vpop.eup %908 }
 0x168   :  { %v911_v31 = vpop.eup %910  ;;  %916 = vtanh.f32 %v909_v30 }
 0x169   :  { %918 = vtanh.f32 %v911_v31 }
 0x16b   :  { %v913_v33 = vpop.eup %912 }
 0x16c   :  { %v915_v34 = vpop.eup %914  ;;  %920 = vtanh.f32 %v913_v33 }
 0x16d   :  { %922 = vtanh.f32 %v915_v34 }
 0x172   :  { %v917_v35 = vpop.eup %916 }
 0x173   :  { %v919_v37 = vpop.eup %918  ;;  %655 = vst [vmem:[#allocation8 + $0x8] sm:$0xff] %v917_v35 }
 0x174   :  { %654 = vst [vmem:[#allocation8] sm:$0xff] %v919_v37 }
 0x176   :  { %v921_v38 = vpop.eup %920 }
 0x177   :  { %v923_v39 = vpop.eup %922  ;;  %657 = vst [vmem:[#allocation8 + $0x18] sm:$0xff] %v921_v38 }
 0x178   :  { %656 = vst [vmem:[#allocation8 + $0x10] sm:$0xff] %v923_v39 }
 0x179   :  { %1001 = shalt.err (!%p998_p0)
}
 0x17a   :  { %s1002_s6 = scalar_lea.hbm %s1282_s4, 512 }
 0x17b   :  { %p1003_p1 = scmp.ne.s32.totalorder %s1282_s4, %s1002_s6  ;;  %p1006_p2 = scmp.lt.u32.totalorder %s1002_s6, %s1282_s4 }
 0x17d   :  { %p1008_p3 = pnand %p1006_p2, %p1003_p1 }
 0x17f   :  { %1011 = shalt.err (!%p1008_p3)
}
 0x180   :  { %669 = dma.vmem_to_hbm [thread:$0]  %s664_s26, 512, %s1282_s4, [#allocation4], %s1020_s27, %s1020_s27, %s1021_s28  }
 0x181   :  { %1016 = dma.done.wait [#allocation4], 512  }
 0x182   :  { %1017 = vsyncadd [#allocation4], 4294966784 }
 0x183   :  { %673 = vsyncpa [#allocation3], 1 }
 0x184   :  { %674 = vsyncpa [#allocation6], 1 }
 0x185   :  { %675 = vsyncpa [#allocation4], 1 }

</bundles_post_ra>
